<compile_context>
chip_gen: v7x
topology: tpu7x:2x2x1
jax: 0.10.0
libtpu: 0.0.40
codegen_flags: <defaults>
</compile_context>

<pallas_src>
import math

import jax
import jax.numpy as jnp
from jax.experimental import pallas as pl
from jax.experimental.pallas import tpu as pltpu

# Layer dims of the original PyTorch module, (in, out) order.
LAYER_DIMS = [(3, 21), (21, 21), (21, 21), (21, 21), (21, 21),
              (21, 21), (21, 21), (21, 20), (20, 3)]
N_LAYERS = len(LAYER_DIMS)
IN_DIM = LAYER_DIMS[0][0]          # 3
OUT_DIM = LAYER_DIMS[-1][1]        # 3

FP = 24            # hidden feature padding: 21 real rows + ones row -> 24 (mult of 8)
IO_P = 8           # input/output sublane padding: 3 real rows (+ ones row on input)
ONE_ROW = FP - 1   # constant-1 row index in hidden activations (23)
IN_ONE_ROW = IN_DIM  # constant-1 row index in the 8-row input slab (3)

MAX_TILE = 4096    # lane-tile cap; VMEM stays tiny, grid-step overhead amortized
_PREC = jax.lax.Precision.DEFAULT  # explicit; matches the previously verified numerics


def _round_up(n, m):
    return ((n + m - 1) // m) * m


# ---------------------------------------------------------------------------
# Kernel factory: fused 9-layer forward on one (IO_P, tile_b) activation block.
#   w_ref: (N_LAYERS, FP, FP) bias-folded weights (PyTorch (out, in) layout,
#          zero-padded, bias in the ones-row column, 1.0 ones-row diagonal)
#   x_ref: (IO_P, tile_b)  input slab, batch on lanes, row IN_ONE_ROW == 1.0
#   o_ref: (IO_P, tile_b)  output slab (rows 0..2 real, rest exactly 0)
# The tile is processed in `n_chunks` chunks of `chunk_b` lanes; within each
# chunk, `n_sub` independent sub-blocks are interleaved through the serial
# layer chain to hide MXU result latency.
# ---------------------------------------------------------------------------
def make_mlp9_kernel(n_layers, n_chunks, chunk_b, n_sub, sub_b):
    def kernel(w_ref, x_ref, o_ref):
        # Hoisted, trace-time static slices of the padded weight slab.
        w_first = w_ref[0][:, :IO_P]               # (FP, IO_P): layer-0, K=8
        w_last = w_ref[n_layers - 1][:IO_P, :]     # (IO_P, FP): only 8 out rows matter

        for c in range(n_chunks):
            base = c * chunk_b
            # Layer 0 (fc1 + ReLU): bias rides in via the ones row of x.
            hs = [
                jnp.maximum(
                    jnp.dot(w_first,
                            x_ref[:, base + s * sub_b: base + (s + 1) * sub_b],
                            preferred_element_type=jnp.float32,
                            precision=_PREC),
                    0.0)
                for s in range(n_sub)
            ]
            # Layers 1..7 (fc2..fc8 + ReLU), ones row self-propagates.
            for layer in range(1, n_layers - 1):
                w = w_ref[layer]                   # (FP, FP), static slab index
                hs = [
                    jnp.maximum(
                        jnp.dot(w, h, preferred_element_type=jnp.float32,
                                precision=_PREC),
                        0.0)
                    for h in hs
                ]
            # Layer 8 (fc9, no ReLU): store this chunk before the next starts.
            for s in range(n_sub):
                o_ref[:, base + s * sub_b: base + (s + 1) * sub_b] = jnp.dot(
                    w_last, hs[s], preferred_element_type=jnp.float32,
                    precision=_PREC).astype(o_ref.dtype)
    return kernel


# ---------------------------------------------------------------------------
# Parameter init (deterministic, PyTorch-style Kaiming-uniform bounds).
# ---------------------------------------------------------------------------
def init_params(key):
    """Per-layer (weight (out, in), bias (out,)) in PyTorch layout."""
    params = []
    for (fan_in, fan_out) in LAYER_DIMS:
        key, kw, kb = jax.random.split(key, 3)
        bound = 1.0 / math.sqrt(fan_in)
        w = jax.random.uniform(kw, (fan_out, fan_in), jnp.float32,
                               minval=-bound, maxval=bound)
        b = jax.random.uniform(kb, (fan_out,), jnp.float32,
                               minval=-bound, maxval=bound)
        params.append((w, b))
    return params


def pack_params(params):
    """Zero-pad + bias-fold all layers into one weight slab (L, FP, FP).

    For layer i: W_aug[:out, :in] = W, W_aug[:out, one_col] = b, and (except
    for the last layer) W_aug[ONE_ROW, one_col] = 1.0 so the constant-1 row
    propagates through every ReLU layer.  one_col is IN_ONE_ROW (=3) for the
    first layer (8-row input slab) and ONE_ROW (=23) for all hidden layers.
    """
    w_slab = jnp.zeros((N_LAYERS, FP, FP), jnp.float32)
    for i, (w, b) in enumerate(params):
        out_d, in_d = w.shape
        one_col = IN_ONE_ROW if i == 0 else ONE_ROW
        w_slab = w_slab.at[i, :out_d, :in_d].set(w)
        w_slab = w_slab.at[i, :out_d, one_col].set(b)
        if i < N_LAYERS - 1:
            w_slab = w_slab.at[i, ONE_ROW, one_col].set(1.0)
    return w_slab


# ---------------------------------------------------------------------------
# Wrapper: batch-gridded pallas_call with a VMEM-resident weight slab.
# ---------------------------------------------------------------------------
def mlp9_forward(x, w_slab):
    batch = x.shape[0]

    # Lane-dense batch tile: multiple of 128, up to MAX_TILE lanes per grid
    # step (double-buffered x/out tiles + slab stay well under 1 MiB of VMEM,
    # so even v7x's 64 MiB is a non-constraint).  At large batch the grid has
    # many steps, which "parallel" semantics can shard across v7x's 2 TCs.
    tile_b = min(MAX_TILE, _round_up(batch, 128))
    batch_pad = _round_up(batch, tile_b)
    grid = (batch_pad // tile_b,)

    # In-kernel chunking: 512-lane chunks (when possible), 2 interleaved
    # 256-lane sub-blocks per chunk.
    if tile_b % 512 == 0:
        chunk_b = 512
    elif tile_b % 256 == 0:
        chunk_b = 256
    else:
        chunk_b = 128
    n_chunks = tile_b // chunk_b
    n_sub = 2 if chunk_b % 256 == 0 else 1
    sub_b = chunk_b // n_sub

    # Transposed, zero-padded 8-row input slab: features on sublanes, batch on
    # lanes, constant-1 row (drives the folded bias) across ALL columns,
    # including batch padding.
    xt = jnp.zeros((IO_P, batch_pad), jnp.float32)
    xt = xt.at[:IN_DIM, :batch].set(x.T.astype(jnp.float32))
    xt = xt.at[IN_ONE_ROW, :].set(1.0)

    kernel = make_mlp9_kernel(N_LAYERS, n_chunks, chunk_b, n_sub, sub_b)

    out_t = pl.pallas_call(
        kernel,
        out_shape=jax.ShapeDtypeStruct((IO_P, batch_pad), jnp.float32),
        grid_spec=pltpu.PrefetchScalarGridSpec(
            num_scalar_prefetch=0,
            grid=grid,
            in_specs=[
                # Weight slab: constant block index -> one DMA, VMEM-resident
                # across all batch tiles.
                pl.BlockSpec((N_LAYERS, FP, FP), lambda i: (0, 0, 0)),
                # Activations: pipelined (8, tile_b) tiles over the batch.
                pl.BlockSpec((IO_P, tile_b), lambda i: (0, i)),
            ],
            out_specs=pl.BlockSpec((IO_P, tile_b), lambda i: (0, i)),
        ),
        compiler_params=pltpu.CompilerParams(
            dimension_semantics=("parallel",),
        ),
    )(w_slab, xt)

    return out_t[:OUT_DIM, :batch].T


# Pure-JAX reference (PyTorch layout: y = x @ W.T + b).
def mlp9_ref(x, params):
    h = x
    for i, (w, b) in enumerate(params):
        h = h @ w.T + b
        if i < len(params) - 1:
            h = jnp.maximum(h, 0.0)
    return h


if __name__ == "__main__":
    key = jax.random.PRNGKey(0)
    key, kx = jax.random.split(key)
    batch = 8
    x = jax.random.normal(kx, (batch, IN_DIM), jnp.float32)

    params = init_params(key)
    w_slab = pack_params(params)

    out = mlp9_forward(x, w_slab)
    out = jax.block_until_ready(out)

    ref = mlp9_ref(x, params)
    assert out.shape == (batch, OUT_DIM)
    # Default-precision TPU matmuls (bias folded into the MXU contraction);
    # accepted tolerance 1e-4 vs. the pure-f32 reference.
    assert jnp.allclose(out, ref, atol=1e-4, rtol=1e-4), (
        f"max abs diff {jnp.max(jnp.abs(out - ref))}")

    print("KERNEL_OK")
</pallas_src>

<mosaic_0001>
module attributes {stable_mosaic.version = 11 : i64} {
  func.func @kernel(%arg0: i32, %arg1: memref<9x24x24xf32, #tpu.memory_space<vmem>>, %arg2: memref<8x128xf32, #tpu.memory_space<vmem>>, %arg3: memref<8x128xf32, #tpu.memory_space<vmem>>) attributes {dimension_semantics = [#tpu.dimension_semantics<parallel>], iteration_bounds = array<i64: 1>, scalar_prefetch = 0 : i64, scratch_operands = 0 : i64, tpu.core_type = #tpu.core_type<tc>, window_params = [{pipeline_mode = #tpu.pipeline_mode<synchronous>, transform_indices = @transform_0, window_bounds = array<i64: 9, 24, 24>}, {transform_indices = @transform_1, window_bounds = array<i64: 8, 128>}, {transform_indices = @transform_2, window_bounds = array<i64: 8, 128>}]} {
    %c0 = arith.constant 0 : index
    %c0_0 = arith.constant 0 : index
    %c0_1 = arith.constant 0 : index
    %0 = vector.load %arg1[%c0, %c0_0, %c0_1] : memref<9x24x24xf32, #tpu.memory_space<vmem>>, vector<1x24x24xf32>
    %1 = vector.shape_cast %0 : vector<1x24x24xf32> to vector<24x24xf32>
    %2 = vector.extract_strided_slice %1 {offsets = [0, 0], sizes = [24, 8], strides = [1, 1]} : vector<24x24xf32> to vector<24x8xf32>
    %c8 = arith.constant 8 : index
    %c0_2 = arith.constant 0 : index
    %c0_3 = arith.constant 0 : index
    %3 = vector.load %arg1[%c8, %c0_2, %c0_3] : memref<9x24x24xf32, #tpu.memory_space<vmem>>, vector<1x24x24xf32>
    %4 = vector.shape_cast %3 : vector<1x24x24xf32> to vector<24x24xf32>
    %5 = vector.extract_strided_slice %4 {offsets = [0, 0], sizes = [8, 24], strides = [1, 1]} : vector<24x24xf32> to vector<8x24xf32>
    %c0_4 = arith.constant 0 : index
    %c0_5 = arith.constant 0 : index
    %6 = vector.load %arg2[%c0_4, %c0_5] : memref<8x128xf32, #tpu.memory_space<vmem>>, vector<8x128xf32>
    %cst = arith.constant dense<0.000000e+00> : vector<24x128xf32>
    %7 = tpu.matmul %2, %6, %cst {dimension_numbers = #tpu.dot_dimension_numbers<[1], [0], [0], [1], [0, 0, 1, 1], [], []>} : vector<24x8xf32>, vector<8x128xf32>, vector<24x128xf32> -> vector<24x128xf32>
    %cst_6 = arith.constant 0.000000e+00 : f32
    %8 = vector.broadcast %cst_6 : f32 to vector<24x128xf32>
    %9 = arith.maximumf %7, %8 : vector<24x128xf32>
    %c1 = arith.constant 1 : index
    %c0_7 = arith.constant 0 : index
    %c0_8 = arith.constant 0 : index
    %10 = vector.load %arg1[%c1, %c0_7, %c0_8] : memref<9x24x24xf32, #tpu.memory_space<vmem>>, vector<1x24x24xf32>
    %11 = vector.shape_cast %10 : vector<1x24x24xf32> to vector<24x24xf32>
    %cst_9 = arith.constant dense<0.000000e+00> : vector<24x128xf32>
    %12 = tpu.matmul %11, %9, %cst_9 {dimension_numbers = #tpu.dot_dimension_numbers<[1], [0], [0], [1], [0, 0, 1, 1], [], []>} : vector<24x24xf32>, vector<24x128xf32>, vector<24x128xf32> -> vector<24x128xf32>
    %cst_10 = arith.constant 0.000000e+00 : f32
    %13 = vector.broadcast %cst_10 : f32 to vector<24x128xf32>
    %14 = arith.maximumf %12, %13 : vector<24x128xf32>
    %c2 = arith.constant 2 : index
    %c0_11 = arith.constant 0 : index
    %c0_12 = arith.constant 0 : index
    %15 = vector.load %arg1[%c2, %c0_11, %c0_12] : memref<9x24x24xf32, #tpu.memory_space<vmem>>, vector<1x24x24xf32>
    %16 = vector.shape_cast %15 : vector<1x24x24xf32> to vector<24x24xf32>
    %cst_13 = arith.constant dense<0.000000e+00> : vector<24x128xf32>
    %17 = tpu.matmul %16, %14, %cst_13 {dimension_numbers = #tpu.dot_dimension_numbers<[1], [0], [0], [1], [0, 0, 1, 1], [], []>} : vector<24x24xf32>, vector<24x128xf32>, vector<24x128xf32> -> vector<24x128xf32>
    %cst_14 = arith.constant 0.000000e+00 : f32
    %18 = vector.broadcast %cst_14 : f32 to vector<24x128xf32>
    %19 = arith.maximumf %17, %18 : vector<24x128xf32>
    %c3 = arith.constant 3 : index
    %c0_15 = arith.constant 0 : index
    %c0_16 = arith.constant 0 : index
    %20 = vector.load %arg1[%c3, %c0_15, %c0_16] : memref<9x24x24xf32, #tpu.memory_space<vmem>>, vector<1x24x24xf32>
    %21 = vector.shape_cast %20 : vector<1x24x24xf32> to vector<24x24xf32>
    %cst_17 = arith.constant dense<0.000000e+00> : vector<24x128xf32>
    %22 = tpu.matmul %21, %19, %cst_17 {dimension_numbers = #tpu.dot_dimension_numbers<[1], [0], [0], [1], [0, 0, 1, 1], [], []>} : vector<24x24xf32>, vector<24x128xf32>, vector<24x128xf32> -> vector<24x128xf32>
    %cst_18 = arith.constant 0.000000e+00 : f32
    %23 = vector.broadcast %cst_18 : f32 to vector<24x128xf32>
    %24 = arith.maximumf %22, %23 : vector<24x128xf32>
    %c4 = arith.constant 4 : index
    %c0_19 = arith.constant 0 : index
    %c0_20 = arith.constant 0 : index
    %25 = vector.load %arg1[%c4, %c0_19, %c0_20] : memref<9x24x24xf32, #tpu.memory_space<vmem>>, vector<1x24x24xf32>
    %26 = vector.shape_cast %25 : vector<1x24x24xf32> to vector<24x24xf32>
    %cst_21 = arith.constant dense<0.000000e+00> : vector<24x128xf32>
    %27 = tpu.matmul %26, %24, %cst_21 {dimension_numbers = #tpu.dot_dimension_numbers<[1], [0], [0], [1], [0, 0, 1, 1], [], []>} : vector<24x24xf32>, vector<24x128xf32>, vector<24x128xf32> -> vector<24x128xf32>
    %cst_22 = arith.constant 0.000000e+00 : f32
    %28 = vector.broadcast %cst_22 : f32 to vector<24x128xf32>
    %29 = arith.maximumf %27, %28 : vector<24x128xf32>
    %c5 = arith.constant 5 : index
    %c0_23 = arith.constant 0 : index
    %c0_24 = arith.constant 0 : index
    %30 = vector.load %arg1[%c5, %c0_23, %c0_24] : memref<9x24x24xf32, #tpu.memory_space<vmem>>, vector<1x24x24xf32>
    %31 = vector.shape_cast %30 : vector<1x24x24xf32> to vector<24x24xf32>
    %cst_25 = arith.constant dense<0.000000e+00> : vector<24x128xf32>
    %32 = tpu.matmul %31, %29, %cst_25 {dimension_numbers = #tpu.dot_dimension_numbers<[1], [0], [0], [1], [0, 0, 1, 1], [], []>} : vector<24x24xf32>, vector<24x128xf32>, vector<24x128xf32> -> vector<24x128xf32>
    %cst_26 = arith.constant 0.000000e+00 : f32
    %33 = vector.broadcast %cst_26 : f32 to vector<24x128xf32>
    %34 = arith.maximumf %32, %33 : vector<24x128xf32>
    %c6 = arith.constant 6 : index
    %c0_27 = arith.constant 0 : index
    %c0_28 = arith.constant 0 : index
    %35 = vector.load %arg1[%c6, %c0_27, %c0_28] : memref<9x24x24xf32, #tpu.memory_space<vmem>>, vector<1x24x24xf32>
    %36 = vector.shape_cast %35 : vector<1x24x24xf32> to vector<24x24xf32>
    %cst_29 = arith.constant dense<0.000000e+00> : vector<24x128xf32>
    %37 = tpu.matmul %36, %34, %cst_29 {dimension_numbers = #tpu.dot_dimension_numbers<[1], [0], [0], [1], [0, 0, 1, 1], [], []>} : vector<24x24xf32>, vector<24x128xf32>, vector<24x128xf32> -> vector<24x128xf32>
    %cst_30 = arith.constant 0.000000e+00 : f32
    %38 = vector.broadcast %cst_30 : f32 to vector<24x128xf32>
    %39 = arith.maximumf %37, %38 : vector<24x128xf32>
    %c7 = arith.constant 7 : index
    %c0_31 = arith.constant 0 : index
    %c0_32 = arith.constant 0 : index
    %40 = vector.load %arg1[%c7, %c0_31, %c0_32] : memref<9x24x24xf32, #tpu.memory_space<vmem>>, vector<1x24x24xf32>
    %41 = vector.shape_cast %40 : vector<1x24x24xf32> to vector<24x24xf32>
    %cst_33 = arith.constant dense<0.000000e+00> : vector<24x128xf32>
    %42 = tpu.matmul %41, %39, %cst_33 {dimension_numbers = #tpu.dot_dimension_numbers<[1], [0], [0], [1], [0, 0, 1, 1], [], []>} : vector<24x24xf32>, vector<24x128xf32>, vector<24x128xf32> -> vector<24x128xf32>
    %cst_34 = arith.constant 0.000000e+00 : f32
    %43 = vector.broadcast %cst_34 : f32 to vector<24x128xf32>
    %44 = arith.maximumf %42, %43 : vector<24x128xf32>
    %cst_35 = arith.constant dense<0.000000e+00> : vector<8x128xf32>
    %45 = tpu.matmul %5, %44, %cst_35 {dimension_numbers = #tpu.dot_dimension_numbers<[1], [0], [0], [1], [0, 0, 1, 1], [], []>} : vector<8x24xf32>, vector<24x128xf32>, vector<8x128xf32> -> vector<8x128xf32>
    %c0_36 = arith.constant 0 : index
    %c0_37 = arith.constant 0 : index
    %46 = vector.load %arg3[%c0_36, %c0_37] : memref<8x128xf32, #tpu.memory_space<vmem>>, vector<8x128xf32>
    tpu.vector_store %arg3[%c0_36, %c0_37], %45 {strides = array<i32>} : memref<8x128xf32, #tpu.memory_space<vmem>>, vector<8x128xf32>,
    return
  }
  func.func @transform_0(%arg0: i32) -> (i32, i32, i32) {
    %c0_i32 = arith.constant 0 : i32
    %c0_i32_0 = arith.constant 0 : i32
    %c0_i32_1 = arith.constant 0 : i32
    %c0_i32_2 = arith.constant 0 : i32
    return %c0_i32, %c0_i32_0, %c0_i32_1 : i32, i32, i32
  }
  func.func @transform_1(%arg0: i32) -> (i32, i32) {
    %c0_i32 = arith.constant 0 : i32
    %c0_i32_0 = arith.constant 0 : i32
    return %c0_i32, %arg0 : i32, i32
  }
  func.func @transform_2(%arg0: i32) -> (i32, i32) {
    %c0_i32 = arith.constant 0 : i32
    %c0_i32_0 = arith.constant 0 : i32
    return %c0_i32, %arg0 : i32, i32
  }
}

</mosaic_0001>

<bundles_post_ra>
// kernel: tpu_custom_call.1
= control target key start
LH: loop header
LB: loop body
LE: loop exit
PB: predicated region body
PF: predicated region fallthrough
CT: control target
= control target key end

     0   :  { %7 = vsyncpa [#allocation3], 0  ;;  %s1352_s0 = inlined_call_operand.hbm [shape: f32[9,24,24], index: 0, kind: input, shape index: {}]   ;;  %s1353_s1 = inlined_call_operand.hbm [shape: f32[8,128], index: 1, kind: input, shape index: {}]   ;;  %s1354_s2 = inlined_call_operand.hbm [shape: f32[8,128], index: 2, kind: output, shape index: {}]  }
   0x1   :  { %8 = vsyncpa [#allocation6], 0 }
   0x2   :  { %9 = vsyncpa [#allocation4], 0  ;;  %s1204_s9 = smov [#allocation2]   ;;  %s1132_s13 = scalar_lea.hbm %s1352_s0, 3456 }
   0x3   :  { %s15_s10 = sshll.u32 %s1204_s9, 4  ;;  %p1133_p0 = scmp.ne.s32.totalorder %s1352_s0, %s1132_s13  ;;  %s16_s10 = int_to_ptr.vmem [resolvable:$true] %s15_s10 }
   0x4   :  { %p1136_p1 = scmp.lt.u32.totalorder %s1132_s13, %s1352_s0 }
   0x6   :  { %p1138_p2 = pnand %p1136_p1, %p1133_p0 }
   0x8   :  { %1141 = shalt.err (!%p1138_p2)
}
   0x9   :  { %s1142_s18 = scalar_lea.vmem %s16_s10, 3456  ;;  %p1147_p4 = scmp.lt.s32.totalorder %s16_s10, %s16_s10 }
   0xa   :  { %p1143_p3 = scmp.ne.s32.totalorder %s16_s10, %s1142_s18  ;;  %p1148_p5 = scmp.lt.s32.totalorder %s1142_s18, %s1142_s18 }
   0xc   :  { %p1149_p6 = por %p1148_p5, %p1147_p4 }
   0xe   :  { %p1150_p7 = pnand %p1149_p6, %p1143_p3 }
  0x10   :  { %1153 = shalt.err (!%p1150_p7)
}
  0x11   :  { %s1205_s19 = smov 128   ;;  %s1206_s20 = smov 8  }
  0x12   :  { %21 = dma.hbm_to_vmem [thread:$0]  %s1352_s0, 3456, %s16_s10, [#allocation3], %s1205_s19, %s1205_s19, %s1206_s20  }
  0x13   :  { %s1207_s23 = smov [#allocation5]   ;;  %s1154_s27 = scalar_lea.hbm %s1353_s1, 128 }
  0x14   :  { %s28_s24 = sshll.u32 %s1207_s23, 4  ;;  %p1155_p8 = scmp.ne.s32.totalorder %s1353_s1, %s1154_s27  ;;  %s29_s24 = int_to_ptr.vmem [resolvable:$true] %s28_s24 }
  0x15   :  { %p1158_p9 = scmp.lt.u32.totalorder %s1154_s27, %s1353_s1 }
  0x17   :  { %p1160_p10 = pnand %p1158_p9, %p1155_p8 }
  0x19   :  { %1163 = shalt.err (!%p1160_p10)
}
  0x1a   :  { %s1164_s4 = scalar_lea.vmem %s29_s24, 128  ;;  %p1169_p12 = scmp.lt.s32.totalorder %s29_s24, %s29_s24 }
  0x1b   :  { %p1165_p11 = scmp.ne.s32.totalorder %s29_s24, %s1164_s4  ;;  %p1170_p13 = scmp.lt.s32.totalorder %s1164_s4, %s1164_s4 }
  0x1d   :  { %p1171_p0 = por %p1170_p13, %p1169_p12 }
  0x1f   :  { %p1172_p1 = pnand %p1171_p0, %p1165_p11 }
  0x21   :  { %1175 = shalt.err (!%p1172_p1)
}
  0x22   :  { %31 = dma.hbm_to_vmem [thread:$0]  %s1353_s1, 128, %s29_s24, [#allocation6]  }
  0x23   :  { %1198 = dma.done.wait [#allocation3], 3456  }
  0x24   :  { %1199 = vsyncadd [#allocation3], 4294963840 }
  0x25   :  { %1200 = dma.done.wait [#allocation6], 128  }
  0x26   :  { %1201 = vsyncadd [#allocation6], 4294967168  ;;  %v1208_v0 = vmov 0.0   ;;  %vm1209_vm0 = vmmov 0   ;;  %vm44_vm1 = vcmask 64512   ;;  %v43_v1 = vld [vmem:[#allocation5] sm:$0xff] }
  0x27   :  { %975 = vmatprep.subr.mxu0 %v1208_v0  ;;  %977 = vmatprep.mubr.msk.f32.mxu0 %vm1209_vm0, %v1208_v0  ;;  %v38_v2 = vld [vmem:[#allocation2] sm:$0xff]  ;;  %v39_v3 = vld [vmem:[#allocation2 + $0x8] sm:$0xff]  ;;  %v40_v4 = vld [vmem:[#allocation2 + $0x10] sm:$0xff]  ;;  %v1210_v5 = vmov 0.0|0.0   ;;  %vm141_vm2 = vcmask 195584   ;;  %s1211_s1 = smov [#allocation7]  }
  0x28   :  { %992 = vmatprep.mubr.msk.f32.mxu1 %vm1209_vm0, %v1208_v0  ;;  %976 = vmatpush3.msra.mxu0 %v43_v1  ;;  %v138_v16 = vld [vmem:[#allocation2 + $0x18] sm:$0xff]  ;;  %v139_v17 = vld [vmem:[#allocation2 + $0x20] sm:$0xff]  ;;  %v140_v18 = vld [vmem:[#allocation2 + $0x28] sm:$0xff]  ;;  %s890_s6 = sshll.u32 %s1211_s1, 4  ;;  %s891_s6 = int_to_ptr.vmem [resolvable:$true] %s890_s6 }
  0x29   :  { %978 = vmatmul.mubr.msk.f32.vlgmr.msra.gmra.mrb[0].mxu0 %vm44_vm1, %v38_v2  ;;  %1100 = vmatprep.subr.bf16.mxu1 %v1210_v5  ;;  %v235_v29 = vld [vmem:[#allocation2 + $0x30] sm:$0xff]  ;;  %v236_v30 = vld [vmem:[#allocation2 + $0x38] sm:$0xff]  ;;  %v237_v31 = vld [vmem:[#allocation2 + $0x40] sm:$0xff]  ;;  %s1176_s7 = scalar_lea.vmem %s891_s6, 128  ;;  %p1181_p3 = scmp.lt.s32.totalorder %s891_s6, %s891_s6 }
  0x2a   :  { %980 = vmatprep.mubr.msk.f32.mxu0 %vm1209_vm0, %v1208_v0  ;;  %1103 = vmatprep.subr.bf16.mxu0 %v1210_v5  ;;  %v331_v42 = vld [vmem:[#allocation2 + $0x48] sm:$0xff]  ;;  %v332_v43 = vld [vmem:[#allocation2 + $0x50] sm:$0xff]  ;;  %v333_v44 = vld [vmem:[#allocation2 + $0x58] sm:$0xff]  ;;  %p1177_p2 = scmp.ne.s32.totalorder %s891_s6, %s1176_s7  ;;  %p1182_p4 = scmp.lt.s32.totalorder %s1176_s7, %s1176_s7 }
  0x2b   :  { %v427_v55 = vld [vmem:[#allocation2 + $0x60] sm:$0xff]  ;;  %v428_v56 = vld [vmem:[#allocation2 + $0x68] sm:$0xff]  ;;  %v429_v57 = vld [vmem:[#allocation2 + $0x70] sm:$0xff] }
  0x2c   :  { %p1183_p5 = por %p1182_p4, %p1181_p3 }
  0x2d   :  { %981 = vmatmul.mubr.msk.f32.gmra.mrb[2].mxu0 %vm44_vm1, %v39_v3 }
  0x2e   :  { %983 = vmatprep.mubr.msk.f32.mxu0 %vm1209_vm0, %v1208_v0  ;;  %p1184_p6 = pnand %p1183_p5, %p1177_p2 }
  0x31   :  { %984 = vmatmul.mubr.msk.f32.gmra.mrb[4].mxu0 %vm44_vm1, %v40_v4 }
  0x32   :  { %1007 = vmatprep.mubr.msk.f32.mxu0 %vm1209_vm0, %v1208_v0 }
  0xfc   :  { %v120_v6 = vpop.f32.mrb[0].mxu0 }
  0xfd   :  { %v979_v7 = vpop.f32.mrb[1].mxu0  ;;  %v134_v9 = vmax.f32 %v120_v6, 0.0  ;;  %v523_v6 = vld [vmem:[#allocation2 + $0x78] sm:$0xff] }
  0xfe   :  { %v524_v7 = vld [vmem:[#allocation2 + $0x80] sm:$0xff] }
 0x100   :  { %v125_v8 = vpop.f32.mrb[2].mxu0 }
 0x101   :  { %v135_v10 = vmax.f32 %v125_v8, 0.0  ;;  %v982_v11 = vpop.f32.mrb[3].mxu0  ;;  %v525_v8 = vld [vmem:[#allocation2 + $0x88] sm:$0xff] }
 0x103   :  { %v1101_v12 = vpack.c.bf16 %v135_v10, %v134_v9 }
 0x104   :  { %v130_v13 = vpop.f32.mrb[4].mxu0 }
 0x105   :  { %v136_v14 = vmax.f32 %v130_v13, 0.0  ;;  %1102 = vmatpush3.bf16.msra.mxu1 %v1101_v12  ;;  %v985_v15 = vpop.f32.mrb[5].mxu0 }
 0x106   :  { %990 = vmatprep.subr.mxu1 %v1208_v0 }
 0x109   :  { %991 = vmatpush3.msra.mxu1 %v136_v14 }
 0x10a   :  { %993 = vmatmul.mubr.msk.f32.vlgmr.msra.gmra.mrb[0].mxu1 %vm141_vm2, %v138_v16  ;;  %1106 = vmatprep.subr.bf16.mxu1 %v1210_v5 }
 0x10b   :  { %995 = vmatprep.mubr.msk.f32.mxu1 %vm1209_vm0, %v1208_v0 }
 0x10e   :  { %996 = vmatmul.mubr.msk.f32.gmra.mrb[2].mxu1 %vm141_vm2, %v139_v17 }
 0x10f   :  { %998 = vmatprep.mubr.msk.f32.mxu1 %vm1209_vm0, %v1208_v0 }
 0x112   :  { %999 = vmatmul.mubr.msk.f32.gmra.mrb[4].mxu1 %vm141_vm2, %v140_v18 }
 0x113   :  { %1022 = vmatprep.mubr.msk.f32.mxu1 %vm1209_vm0, %v1208_v0 }
 0x1dd   :  { %v217_v19 = vpop.f32.mrb[0].mxu1 }
 0x1de   :  { %v994_v20 = vpop.f32.mrb[1].mxu1  ;;  %v231_v22 = vmax.f32 %v217_v19, 0.0  ;;  %v619_v19 = vld [vmem:[#allocation2 + $0x90] sm:$0xff] }
 0x1df   :  { %v620_v20 = vld [vmem:[#allocation2 + $0x98] sm:$0xff] }
 0x1e1   :  { %v222_v21 = vpop.f32.mrb[2].mxu1 }
 0x1e2   :  { %v232_v23 = vmax.f32 %v222_v21, 0.0  ;;  %v997_v24 = vpop.f32.mrb[3].mxu1  ;;  %v621_v21 = vld [vmem:[#allocation2 + $0xa0] sm:$0xff] }
 0x1e4   :  { %v1104_v25 = vpack.c.bf16 %v232_v23, %v231_v22 }
 0x1e5   :  { %v227_v26 = vpop.f32.mrb[4].mxu1 }
 0x1e6   :  { %v233_v27 = vmax.f32 %v227_v26, 0.0  ;;  %1105 = vmatpush3.bf16.msra.mxu0 %v1104_v25  ;;  %v1000_v28 = vpop.f32.mrb[5].mxu1 }
 0x1e7   :  { %1005 = vmatprep.subr.mxu0 %v1208_v0 }
 0x1ea   :  { %1006 = vmatpush3.msra.mxu0 %v233_v27 }
 0x1eb   :  { %1008 = vmatmul.mubr.msk.f32.vlgmr.msra.gmra.mrb[6].mxu0 %vm141_vm2, %v235_v29  ;;  %1109 = vmatprep.subr.bf16.mxu0 %v1210_v5 }
 0x1ec   :  { %1010 = vmatprep.mubr.msk.f32.mxu0 %vm1209_vm0, %v1208_v0 }
 0x1ef   :  { %1011 = vmatmul.mubr.msk.f32.gmra.mrb[8].mxu0 %vm141_vm2, %v236_v30 }
 0x1f0   :  { %1013 = vmatprep.mubr.msk.f32.mxu0 %vm1209_vm0, %v1208_v0 }
 0x1f3   :  { %1014 = vmatmul.mubr.msk.f32.gmra.mrb[10].mxu0 %vm141_vm2, %v237_v31  ;;  %v715_v31 = vld [vmem:[#allocation2 + $0xa8] sm:$0xff] }
 0x1f4   :  { %1037 = vmatprep.mubr.msk.f32.mxu0 %vm1209_vm0, %v1208_v0 }
 0x2be   :  { %v313_v32 = vpop.f32.mrb[6].mxu0 }
 0x2bf   :  { %v1009_v33 = vpop.f32.mrb[7].mxu0  ;;  %v327_v35 = vmax.f32 %v313_v32, 0.0  ;;  %v716_v32 = vld [vmem:[#allocation2 + $0xb0] sm:$0xff] }
 0x2c0   :  { %v717_v33 = vld [vmem:[#allocation2 + $0xb8] sm:$0xff] }
 0x2c2   :  { %v318_v34 = vpop.f32.mrb[8].mxu0 }
 0x2c3   :  { %v328_v36 = vmax.f32 %v318_v34, 0.0  ;;  %v1012_v37 = vpop.f32.mrb[9].mxu0 }
 0x2c5   :  { %v1107_v38 = vpack.c.bf16 %v328_v36, %v327_v35 }
 0x2c6   :  { %v323_v39 = vpop.f32.mrb[10].mxu0 }
 0x2c7   :  { %v329_v40 = vmax.f32 %v323_v39, 0.0  ;;  %1108 = vmatpush3.bf16.msra.mxu1 %v1107_v38  ;;  %v1015_v41 = vpop.f32.mrb[11].mxu0 }
 0x2c8   :  { %1020 = vmatprep.subr.mxu1 %v1208_v0 }
 0x2cb   :  { %1021 = vmatpush3.msra.mxu1 %v329_v40 }
 0x2cc   :  { %1023 = vmatmul.mubr.msk.f32.vlgmr.msra.gmra.mrb[6].mxu1 %vm141_vm2, %v331_v42  ;;  %1112 = vmatprep.subr.bf16.mxu1 %v1210_v5 }
 0x2cd   :  { %1025 = vmatprep.mubr.msk.f32.mxu1 %vm1209_vm0, %v1208_v0 }
 0x2d0   :  { %1026 = vmatmul.mubr.msk.f32.gmra.mrb[8].mxu1 %vm141_vm2, %v332_v43 }
 0x2d1   :  { %1028 = vmatprep.mubr.msk.f32.mxu1 %vm1209_vm0, %v1208_v0 }
 0x2d4   :  { %1029 = vmatmul.mubr.msk.f32.gmra.mrb[10].mxu1 %vm141_vm2, %v333_v44  ;;  %v42_v44 = vld [vmem:[#allocation2 + $0xc0] sm:$0xff] }
 0x2d5   :  { %1052 = vmatprep.mubr.msk.f32.mxu1 %vm1209_vm0, %v1208_v0 }
 0x39f   :  { %v409_v45 = vpop.f32.mrb[6].mxu1 }
 0x3a0   :  { %v1024_v46 = vpop.f32.mrb[7].mxu1  ;;  %v423_v48 = vmax.f32 %v409_v45, 0.0 }
 0x3a3   :  { %v414_v47 = vpop.f32.mrb[8].mxu1 }
 0x3a4   :  { %v424_v49 = vmax.f32 %v414_v47, 0.0  ;;  %v1027_v50 = vpop.f32.mrb[9].mxu1 }
 0x3a6   :  { %v1110_v51 = vpack.c.bf16 %v424_v49, %v423_v48 }
 0x3a7   :  { %v419_v52 = vpop.f32.mrb[10].mxu1 }
 0x3a8   :  { %v425_v53 = vmax.f32 %v419_v52, 0.0  ;;  %1111 = vmatpush3.bf16.msra.mxu0 %v1110_v51  ;;  %v1030_v54 = vpop.f32.mrb[11].mxu1 }
 0x3a9   :  { %1035 = vmatprep.subr.mxu0 %v1208_v0 }
 0x3ac   :  { %1036 = vmatpush3.msra.mxu0 %v425_v53 }
 0x3ad   :  { %1038 = vmatmul.mubr.msk.f32.vlgmr.msra.gmra.mrb[12].mxu0 %vm141_vm2, %v427_v55  ;;  %1115 = vmatprep.subr.bf16.mxu0 %v1210_v5 }
 0x3ae   :  { %1040 = vmatprep.mubr.msk.f32.mxu0 %vm1209_vm0, %v1208_v0 }
 0x3b1   :  { %1041 = vmatmul.mubr.msk.f32.gmra.mrb[14].mxu0 %vm141_vm2, %v428_v56 }
 0x3b2   :  { %1043 = vmatprep.mubr.msk.f32.mxu0 %vm1209_vm0, %v1208_v0 }
 0x3b5   :  { %1044 = vmatmul.mubr.msk.f32.gmra.mrb[16].mxu0 %vm141_vm2, %v429_v57 }
 0x3b6   :  { %1067 = vmatprep.mubr.msk.f32.mxu0 %vm1209_vm0, %v1208_v0 }
 0x480   :  { %v505_v58 = vpop.f32.mrb[12].mxu0 }
 0x481   :  { %v1039_v59 = vpop.f32.mrb[13].mxu0  ;;  %v519_v61 = vmax.f32 %v505_v58, 0.0 }
 0x484   :  { %v510_v60 = vpop.f32.mrb[14].mxu0 }
 0x485   :  { %v520_v62 = vmax.f32 %v510_v60, 0.0  ;;  %v1042_v63 = vpop.f32.mrb[15].mxu0 }
 0x487   :  { %v1113_v1 = vpack.c.bf16 %v520_v62, %v519_v61 }
 0x488   :  { %v515_v2 = vpop.f32.mrb[16].mxu0 }
 0x489   :  { %v521_v3 = vmax.f32 %v515_v2, 0.0  ;;  %1114 = vmatpush3.bf16.msra.mxu1 %v1113_v1  ;;  %v1045_v4 = vpop.f32.mrb[17].mxu0 }
 0x48a   :  { %1050 = vmatprep.subr.mxu1 %v1208_v0 }
 0x48d   :  { %1051 = vmatpush3.msra.mxu1 %v521_v3 }
 0x48e   :  { %1053 = vmatmul.mubr.msk.f32.vlgmr.msra.gmra.mrb[12].mxu1 %vm141_vm2, %v523_v6  ;;  %1118 = vmatprep.subr.bf16.mxu1 %v1210_v5 }
 0x48f   :  { %1055 = vmatprep.mubr.msk.f32.mxu1 %vm1209_vm0, %v1208_v0 }
 0x492   :  { %1056 = vmatmul.mubr.msk.f32.gmra.mrb[14].mxu1 %vm141_vm2, %v524_v7 }
 0x493   :  { %1058 = vmatprep.mubr.msk.f32.mxu1 %vm1209_vm0, %v1208_v0 }
 0x496   :  { %1059 = vmatmul.mubr.msk.f32.gmra.mrb[16].mxu1 %vm141_vm2, %v525_v8 }
 0x497   :  { %1082 = vmatprep.mubr.msk.f32.mxu1 %vm1209_vm0, %v1208_v0 }
 0x561   :  { %v601_v9 = vpop.f32.mrb[12].mxu1 }
 0x562   :  { %v1054_v10 = vpop.f32.mrb[13].mxu1  ;;  %v615_v12 = vmax.f32 %v601_v9, 0.0 }
 0x565   :  { %v606_v11 = vpop.f32.mrb[14].mxu1 }
 0x566   :  { %v616_v13 = vmax.f32 %v606_v11, 0.0  ;;  %v1057_v14 = vpop.f32.mrb[15].mxu1 }
 0x568   :  { %v1116_v15 = vpack.c.bf16 %v616_v13, %v615_v12 }
 0x569   :  { %v611_v16 = vpop.f32.mrb[16].mxu1 }
 0x56a   :  { %v617_v17 = vmax.f32 %v611_v16, 0.0  ;;  %1117 = vmatpush3.bf16.msra.mxu0 %v1116_v15  ;;  %v1060_v18 = vpop.f32.mrb[17].mxu1 }
 0x56b   :  { %1065 = vmatprep.subr.mxu0 %v1208_v0 }
 0x56e   :  { %1066 = vmatpush3.msra.mxu0 %v617_v17 }
 0x56f   :  { %1068 = vmatmul.mubr.msk.f32.vlgmr.msra.gmra.mrb[18].mxu0 %vm141_vm2, %v619_v19  ;;  %1121 = vmatprep.subr.bf16.mxu0 %v1210_v5 }
 0x570   :  { %1070 = vmatprep.mubr.msk.f32.mxu0 %vm1209_vm0, %v1208_v0 }
 0x573   :  { %1071 = vmatmul.mubr.msk.f32.gmra.mrb[20].mxu0 %vm141_vm2, %v620_v20 }
 0x574   :  { %1073 = vmatprep.mubr.msk.f32.mxu0 %vm1209_vm0, %v1208_v0 }
 0x577   :  { %1074 = vmatmul.mubr.msk.f32.gmra.mrb[22].mxu0 %vm141_vm2, %v621_v21 }
 0x578   :  { %1097 = vmatprep.mubr.msk.f32.mxu0 %vm1209_vm0, %v1208_v0 }
 0x642   :  { %v697_v22 = vpop.f32.mrb[18].mxu0 }
 0x643   :  { %v1069_v23 = vpop.f32.mrb[19].mxu0  ;;  %v711_v25 = vmax.f32 %v697_v22, 0.0 }
 0x646   :  { %v702_v24 = vpop.f32.mrb[20].mxu0 }
 0x647   :  { %v712_v5 = vmax.f32 %v702_v24, 0.0  ;;  %v1072_v26 = vpop.f32.mrb[21].mxu0 }
 0x649   :  { %v1119_v27 = vpack.c.bf16 %v712_v5, %v711_v25 }
 0x64a   :  { %v707_v28 = vpop.f32.mrb[22].mxu0 }
 0x64b   :  { %v713_v29 = vmax.f32 %v707_v28, 0.0  ;;  %1120 = vmatpush3.bf16.msra.mxu1 %v1119_v27  ;;  %v1075_v30 = vpop.f32.mrb[23].mxu0 }
 0x64c   :  { %1080 = vmatprep.subr.mxu1 %v1208_v0 }
 0x64f   :  { %1081 = vmatpush3.msra.mxu1 %v713_v29 }
 0x650   :  { %1083 = vmatmul.mubr.msk.f32.vlgmr.msra.gmra.mrb[18].mxu1 %vm141_vm2, %v715_v31 }
 0x651   :  { %1085 = vmatprep.mubr.msk.f32.mxu1 %vm1209_vm0, %v1208_v0 }
 0x654   :  { %1086 = vmatmul.mubr.msk.f32.gmra.mrb[20].mxu1 %vm141_vm2, %v716_v32 }
 0x655   :  { %1088 = vmatprep.mubr.msk.f32.mxu1 %vm1209_vm0, %v1208_v0 }
 0x658   :  { %1089 = vmatmul.mubr.msk.f32.gmra.mrb[22].mxu1 %vm141_vm2, %v717_v33 }
 0x723   :  { %v793_v34 = vpop.f32.mrb[18].mxu1 }
 0x724   :  { %v1084_v35 = vpop.f32.mrb[19].mxu1  ;;  %v807_v37 = vmax.f32 %v793_v34, 0.0 }
 0x727   :  { %v798_v36 = vpop.f32.mrb[20].mxu1 }
 0x728   :  { %v808_v38 = vmax.f32 %v798_v36, 0.0  ;;  %v1087_v39 = vpop.f32.mrb[21].mxu1 }
 0x72a   :  { %v1122_v40 = vpack.c.bf16 %v808_v38, %v807_v37 }
 0x72b   :  { %v803_v41 = vpop.f32.mrb[22].mxu1 }
 0x72c   :  { %1123 = vmatpush3.bf16.msra.mxu0 %v1122_v40  ;;  %v809_v42 = vmax.f32 %v803_v41, 0.0  ;;  %v1090_v43 = vpop.f32.mrb[23].mxu1 }
 0x72d   :  { %1095 = vmatprep.subr.mxu0 %v1208_v0 }
 0x730   :  { %1096 = vmatpush3.msra.mxu0 %v809_v42 }
 0x731   :  { %1098 = vmatmul.mubr.msk.f32.vlgmr.msra.gmra.mrb[24].mxu0 %vm141_vm2, %v42_v44 }
 0x804   :  { %v879_v45 = vpop.f32.mrb[24].mxu0 }
 0x805   :  { %883 = vst [vmem:[#allocation7] sm:$0xff] %v879_v45  ;;  %v1099_v46 = vpop.f32.mrb[25].mxu0 }
 0x806   :  { %1187 = shalt.err (!%p1184_p6)
}
 0x807   :  { %s1188_s10 = scalar_lea.hbm %s1354_s2, 128 }
 0x808   :  { %p1189_p7 = scmp.ne.s32.totalorder %s1354_s2, %s1188_s10  ;;  %p1192_p8 = scmp.lt.u32.totalorder %s1188_s10, %s1354_s2 }
 0x80a   :  { %p1194_p9 = pnand %p1192_p8, %p1189_p7 }
 0x80c   :  { %1197 = shalt.err (!%p1194_p9)
}
 0x80d   :  { %893 = dma.vmem_to_hbm [thread:$0]  %s891_s6, 128, %s1354_s2, [#allocation4]  }
 0x80e   :  { %1202 = dma.done.wait [#allocation4], 128  }
 0x80f   :  { %1203 = vsyncadd [#allocation4], 4294967168 }
 0x810   :  { %897 = vsyncpa [#allocation3], 1 }
 0x811   :  { %898 = vsyncpa [#allocation6], 1 }
 0x812   :  { %899 = vsyncpa [#allocation4], 1 }

</bundles_post_ra>
